<compile_context>
chip_gen: v7x
topology: tpu7x:2x2x1
jax: 0.10.0
libtpu: 0.0.40
codegen_flags: <defaults>
</compile_context>

<pallas_src>
import functools

import jax
import jax.numpy as jnp
from jax.experimental import pallas as pl
from jax.experimental.pallas import tpu as pltpu

EPS = 1e-5          # PyTorch BatchNorm1d default eps
_LANES = 128        # lane width: pad C_out to a multiple of this
_TILE_L_MAX = 512   # max output rows per tile (use ~256 on v5e if store-pressure bound)


def _round_up(x, m):
    return (x + m - 1) // m * m


# --------------------------------------------------------------------------- #
# Fused kernel (one (batch, L-tile) grid step)
# --------------------------------------------------------------------------- #
def _resblock_kernel(x_ref, w1_ref, w2_ref, *rest, stride, l_out, tile_l,
                     fold_conv1, has_projection):
    """Fused ResidualBlock1D tile.

    x_ref : (stride, Q2, C_in_eff)   phase-split, zero-padded input (one batch element,
                                     resident across the L-tile axis)
    w1_ref: (3*C_in_eff, C_out_p) if fold_conv1 else (3, C_in_eff, C_out_p)   bn1 folded in
    w2_ref: (3*C_out_p, C_out_p)     conv2 weight, taps folded along K, bn2 folded in
    ws_ref: (C_in, C_out_p)          [projection shortcut only] 1x1 weight, bn folded in
    b*_ref: (1, C_out_p) f32         folded BN shifts
    o_ref : (tile_l, C_out_p)        output tile
    h1_ref: (tile_l+2, C_out_p)      scratch (compute dtype): relu(bn1(conv1)) + conv2 halo
    """
    if has_projection:
        ws_ref, b1_ref, b2_ref, bs_ref, o_ref, h1_ref = rest
    else:
        b1_ref, b2_ref, o_ref, h1_ref = rest

    cp = o_ref.shape[-1]
    hp = tile_l + 2
    r0 = pl.multiple_of(pl.program_id(1) * tile_l, 8)

    # ---- conv1 + bn1 + relu for h1 rows [r0-1, r0+tile_l+1) (2-row halo for conv2) ----
    # x layout: x_ph[p, m, :] == x_padded[stride*(m-1) + p, :]  (zeros outside the data),
    # so the tap read for h1 row j is x_ph[tap % stride, j + tap//stride + 1, :].
    if fold_conv1:
        x_cat = jnp.concatenate(
            [x_ref[tap % stride, pl.ds(r0 + tap // stride, hp), :] for tap in range(3)],
            axis=-1)
        acc1 = jnp.dot(x_cat, w1_ref[...], preferred_element_type=jnp.float32)
    else:
        acc1 = jnp.zeros((hp, cp), jnp.float32)
        for tap in range(3):
            xt = x_ref[tap % stride, pl.ds(r0 + tap // stride, hp), :]
            acc1 = acc1 + jnp.dot(xt, w1_ref[tap], preferred_element_type=jnp.float32)

    # mask the conv2 zero-padding rows (h1[-1] and h1[>= l_out]); also kills tail garbage
    row = jax.lax.broadcasted_iota(jnp.int32, (hp, 1), 0) + (r0 - 1)
    valid = (row >= 0) & (row < l_out)
    h1 = jnp.where(valid, jnp.maximum(acc1 + b1_ref[...], 0.0), 0.0)
    h1_ref[...] = h1.astype(h1_ref.dtype)

    # ---- conv2 + bn2: taps folded into a single K = 3*C_out_p matmul ----
    h_cat = jnp.concatenate(
        [h1_ref[pl.ds(tap, tile_l), :] for tap in range(3)], axis=-1)
    out = jnp.dot(h_cat, w2_ref[...], preferred_element_type=jnp.float32) + b2_ref[...]

    # ---- shortcut + residual add + relu ----
    xs = x_ref[1 % stride, pl.ds(r0 + 1 // stride + 1, tile_l), :]   # x rows stride*j
    if has_projection:
        out = out + jnp.dot(xs, ws_ref[...], preferred_element_type=jnp.float32) + bs_ref[...]
    else:
        # identity shortcut: channels pre-padded to C_out_p host-side -> plain VPU add
        out = out + xs.astype(jnp.float32)
    o_ref[...] = jnp.maximum(out, 0.0).astype(o_ref.dtype)


# --------------------------------------------------------------------------- #
# Host-side glue: BN folding, weight layout, phase-split input, pallas_call
# --------------------------------------------------------------------------- #
def _fold_bn(bn):
    gamma, beta, mean, var = bn
    scale = gamma * jax.lax.rsqrt(var + EPS)
    shift = beta - mean * scale
    return scale, shift


def _pad_cols(a, cols):
    return jnp.pad(a, [(0, 0)] * (a.ndim - 1) + [(0, cols - a.shape[-1])])


@functools.partial(jax.jit, static_argnames=("stride", "compute_dtype", "tile_l"))
def residual_block_1d(x_ncl, params, stride=1, compute_dtype=jnp.bfloat16, tile_l=None):
    """x_ncl: (N, C_in, L) -> (N, C_out, L_out), eval-mode ResidualBlock1D."""
    n, c_in, l = x_ncl.shape
    c_out = params["w1"].shape[0]
    c_out_p = _round_up(c_out, _LANES)                 # lane-dense output channels
    l_out = (l - 1) // stride + 1                      # conv1 output length (pad=1, k=3)
    out_dtype = x_ncl.dtype

    has_projection = "ws" in params
    if not has_projection and (stride != 1 or c_in != c_out):
        raise ValueError("identity shortcut requires stride == 1 and c_in == c_out")
    # identity shortcut: pad input channels to C_out_p so the residual add is lane-aligned
    c_in_eff = c_out_p if not has_projection else c_in
    fold_conv1 = (c_in_eff % _LANES == 0)

    tl = _round_up(tile_l or min(_TILE_L_MAX, _round_up(l_out, 8)), 8)
    num_t = pl.cdiv(l_out, tl)
    h = num_t * tl                                     # padded output length

    # Input: channels-last, compute dtype, front pad of (stride + 1) zero rows
    # (j = -1 halo + conv left pad), tail zeros, then phase-split so every in-kernel
    # tap read is a contiguous, non-negative row slice.
    q2 = h + 2 + 2 // stride
    x_nlc = jnp.transpose(x_ncl, (0, 2, 1)).astype(compute_dtype)
    x_pad = jnp.pad(x_nlc, ((0, 0),
                            (stride + 1, stride * q2 - (stride + 1) - l),
                            (0, c_in_eff - c_in)))
    x_ph = x_pad.reshape(n, q2, stride, c_in_eff).transpose(0, 2, 1, 3)  # (N, stride, Q2, C)

    # Weights: channels-last, BN scale folded in, padded, taps folded along K.
    s1, b1 = _fold_bn(params["bn1"])
    s2, b2 = _fold_bn(params["bn2"])
    w1 = jnp.transpose(params["w1"], (2, 1, 0)) * s1[None, None, :]       # (3, C_in, C_out)
    w1 = jnp.pad(w1, ((0, 0), (0, c_in_eff - c_in), (0, c_out_p - c_out)))
    if fold_conv1:
        w1 = w1.reshape(3 * c_in_eff, c_out_p)
    w1 = w1.astype(compute_dtype)
    w2 = jnp.transpose(params["w2"], (2, 1, 0)) * s2[None, None, :]       # (3, C_out, C_out)
    w2 = jnp.pad(w2, ((0, 0), (0, c_out_p - c_out), (0, c_out_p - c_out)))
    w2 = w2.reshape(3 * c_out_p, c_out_p).astype(compute_dtype)
    b1p = _pad_cols(b1[None, :], c_out_p).astype(jnp.float32)
    b2p = _pad_cols(b2[None, :], c_out_p).astype(jnp.float32)

    w1_spec = (pl.BlockSpec((3 * c_in_eff, c_out_p), lambda b, t: (0, 0)) if fold_conv1
               else pl.BlockSpec((3, c_in_eff, c_out_p), lambda b, t: (0, 0, 0)))
    vec_spec = pl.BlockSpec((1, c_out_p), lambda b, t: (0, 0))
    in_specs = [
        pl.BlockSpec((None, stride, q2, c_in_eff), lambda b, t: (b, 0, 0, 0)),
        w1_spec,
        pl.BlockSpec((3 * c_out_p, c_out_p), lambda b, t: (0, 0)),
    ]
    operands = [x_ph, w1, w2]
    if has_projection:
        ss, bs = _fold_bn(params["bns"])
        ws = jnp.transpose(params["ws"][:, :, 0], (1, 0)) * ss[None, :]    # (C_in, C_out)
        ws = _pad_cols(ws, c_out_p).astype(compute_dtype)
        bsp = _pad_cols(bs[None, :], c_out_p).astype(jnp.float32)
        in_specs.append(pl.BlockSpec((c_in_eff, c_out_p), lambda b, t: (0, 0)))
        operands.append(ws)
    in_specs += [vec_spec, vec_spec]
    operands += [b1p, b2p]
    if has_projection:
        in_specs.append(vec_spec)
        operands.append(bsp)

    # VMEM budget (conservative): sized from the actual buffers instead of the default limit.
    cd = jnp.dtype(compute_dtype).itemsize
    od = jnp.dtype(out_dtype).itemsize
    vmem_bytes = (
        2 * stride * q2 * c_in_eff * cd                 # resident input (double-buffered)
        + 2 * (w1.size + w2.size) * cd                  # weights (double-buffered)
        + (2 * c_in_eff * c_out_p * cd if has_projection else 0)
        + 6 * c_out_p * 4                               # bias rows
        + 2 * tl * c_out_p * od                         # output tile (double-buffered)
        + (tl + 2) * c_out_p * cd                       # h1 scratch
        + (tl + 2) * c_out_p * 4                        # conv1 f32 accumulator
        + tl * 3 * c_out_p * cd                         # conv2 folded-K operand staging
        + 3 * tl * c_out_p * 4                          # epilogue f32 temporaries
    )
    vmem_limit = int(min(max(2 * vmem_bytes, 8 << 20) + (2 << 20), 128 << 20))

    kernel = functools.partial(
        _resblock_kernel, stride=stride, l_out=l_out, tile_l=tl,
        fold_conv1=fold_conv1, has_projection=has_projection)
    y = pl.pallas_call(
        kernel,
        out_shape=jax.ShapeDtypeStruct((n, h, c_out_p), out_dtype),
        grid_spec=pltpu.PrefetchScalarGridSpec(
            num_scalar_prefetch=0,
            grid=(n, num_t),
            in_specs=in_specs,
            out_specs=pl.BlockSpec((None, tl, c_out_p), lambda b, t: (b, t, 0)),
            scratch_shapes=[pltpu.VMEM((tl + 2, c_out_p), compute_dtype)],
        ),
        compiler_params=pltpu.CompilerParams(
            dimension_semantics=("parallel", "parallel"),
            vmem_limit_bytes=vmem_limit),
    )(*operands)

    return jnp.transpose(y[:, :l_out, :c_out], (0, 2, 1))


# --------------------------------------------------------------------------- #
# Deterministic parameter init + pure-JAX reference for verification
# --------------------------------------------------------------------------- #
def init_params(key, c_in, c_out, stride):
    ks = jax.random.split(key, 12)

    def bn(k0, k1, k2, k3, c):
        gamma = 1.0 + 0.1 * jax.random.normal(k0, (c,), jnp.float32)
        beta = 0.1 * jax.random.normal(k1, (c,), jnp.float32)
        mean = 0.1 * jax.random.normal(k2, (c,), jnp.float32)
        var = 1.0 + 0.5 * jax.random.uniform(k3, (c,), jnp.float32)
        return (gamma, beta, mean, var)

    params = {
        "w1": 0.1 * jax.random.normal(ks[0], (c_out, c_in, 3), jnp.float32),
        "bn1": bn(ks[1], ks[2], ks[3], ks[4], c_out),
        "w2": 0.1 * jax.random.normal(ks[5], (c_out, c_out, 3), jnp.float32),
        "bn2": bn(ks[6], ks[7], ks[8], ks[9], c_out),
    }
    if stride != 1 or c_in != c_out:
        params["ws"] = 0.1 * jax.random.normal(ks[10], (c_out, c_in, 1), jnp.float32)
        params["bns"] = bn(ks[11], ks[0], ks[5], ks[10], c_out)
    return params


def _ref_conv(x, w, stride):
    pad = (w.shape[2] - 1) // 2
    return jax.lax.conv_general_dilated(
        x, w, window_strides=(stride,), padding=[(pad, pad)],
        dimension_numbers=("NCH", "OIH", "NCH"))


def _ref_bn(x, bn):
    gamma, beta, mean, var = bn
    inv = gamma / jnp.sqrt(var + EPS)
    return (x - mean[None, :, None]) * inv[None, :, None] + beta[None, :, None]


def reference(x, params, stride):
    h = jnp.maximum(_ref_bn(_ref_conv(x, params["w1"], stride), params["bn1"]), 0.0)
    h = _ref_bn(_ref_conv(h, params["w2"], 1), params["bn2"])
    if "ws" in params:
        sc = _ref_bn(_ref_conv(x, params["ws"], stride), params["bns"])
    else:
        sc = x
    return jnp.maximum(h + sc, 0.0)


# --------------------------------------------------------------------------- #
if __name__ == "__main__":
    key = jax.random.PRNGKey(0)
    kx, kp1, kp2 = jax.random.split(key, 3)

    # Case 1: projection shortcut (stride=2, C_in != C_out)
    N, C_IN, C_OUT, L, STRIDE = 2, 4, 8, 16, 2
    x = jax.random.normal(kx, (N, C_IN, L), jnp.float32)
    params = init_params(kp1, C_IN, C_OUT, STRIDE)
    ref = jax.block_until_ready(reference(x, params, STRIDE))

    out_f32 = jax.block_until_ready(
        residual_block_1d(x, params, stride=STRIDE, compute_dtype=jnp.float32))
    assert out_f32.shape == ref.shape == (N, C_OUT, (L - 1) // STRIDE + 1)
    assert jnp.allclose(out_f32, ref, rtol=1e-4, atol=1e-4), (
        f"fp32 max abs err = {jnp.max(jnp.abs(out_f32 - ref))}")

    out_bf16 = jax.block_until_ready(
        residual_block_1d(x, params, stride=STRIDE, compute_dtype=jnp.bfloat16))
    assert jnp.allclose(out_bf16, ref, rtol=2e-2, atol=2e-2), (
        f"bf16 max abs err = {jnp.max(jnp.abs(out_bf16 - ref))}")

    # Case 2: identity shortcut (stride=1, C_in == C_out) -- exercises folded conv1 path
    N2, C2, L2 = 2, 8, 16
    x2 = jax.random.normal(kx, (N2, C2, L2), jnp.float32)
    params2 = init_params(kp2, C2, C2, 1)
    ref2 = jax.block_until_ready(reference(x2, params2, 1))
    out2 = jax.block_until_ready(
        residual_block_1d(x2, params2, stride=1, compute_dtype=jnp.float32))
    assert jnp.allclose(out2, ref2, rtol=1e-4, atol=1e-4), (
        f"identity max abs err = {jnp.max(jnp.abs(out2 - ref2))}")

    print("KERNEL_OK")
</pallas_src>

<mosaic_0001>
module attributes {stable_mosaic.version = 11 : i64} {
  func.func @_resblock_kernel(%arg0: i32, %arg1: i32, %arg2: memref<1x2x11x4xf32, #tpu.memory_space<vmem>>, %arg3: memref<3x4x128xf32, #tpu.memory_space<vmem>>, %arg4: memref<384x128xf32, #tpu.memory_space<vmem>>, %arg5: memref<4x128xf32, #tpu.memory_space<vmem>>, %arg6: memref<1x128xf32, #tpu.memory_space<vmem>>, %arg7: memref<1x128xf32, #tpu.memory_space<vmem>>, %arg8: memref<1x128xf32, #tpu.memory_space<vmem>>, %arg9: memref<1x8x128xf32, #tpu.memory_space<vmem>>, %arg10: memref<10x128xf32, #tpu.memory_space<vmem>>) attributes {dimension_semantics = [#tpu.dimension_semantics<parallel>, #tpu.dimension_semantics<parallel>], iteration_bounds = array<i64: 2, 1>, scalar_prefetch = 0 : i64, scratch_operands = 1 : i64, tpu.core_type = #tpu.core_type<tc>, window_params = [{transform_indices = @transform_0, window_bounds = array<i64: 1, 2, 11, 4>}, {pipeline_mode = #tpu.pipeline_mode<synchronous>, transform_indices = @transform_1, window_bounds = array<i64: 3, 4, 128>}, {pipeline_mode = #tpu.pipeline_mode<synchronous>, transform_indices = @transform_2, window_bounds = array<i64: 384, 128>}, {pipeline_mode = #tpu.pipeline_mode<synchronous>, transform_indices = @transform_3, window_bounds = array<i64: 4, 128>}, {pipeline_mode = #tpu.pipeline_mode<synchronous>, transform_indices = @transform_4, window_bounds = array<i64: 1, 128>}, {pipeline_mode = #tpu.pipeline_mode<synchronous>, transform_indices = @transform_5, window_bounds = array<i64: 1, 128>}, {pipeline_mode = #tpu.pipeline_mode<synchronous>, transform_indices = @transform_6, window_bounds = array<i64: 1, 128>}, {transform_indices = @transform_7, window_bounds = array<i64: 1, 8, 128>}]} {
    %c8_i32 = arith.constant 8 : i32
    %0 = arith.muli %arg1, %c8_i32 : i32
    %1 = tpu.assume_multiple %0, 8 : i32
    %cst = arith.constant 0.000000e+00 : f32
    %2 = vector.broadcast %cst : f32 to vector<10x128xf32>
    %c0_i32 = arith.constant 0 : i32
    %3 = arith.addi %1, %c0_i32 : i32
    %c0 = arith.constant 0 : index
    %c0_0 = arith.constant 0 : index
    %4 = arith.index_cast %3 : i32 to index
    %c0_1 = arith.constant 0 : index
    %5 = vector.load %arg2[%c0, %c0_0, %4, %c0_1] : memref<1x2x11x4xf32, #tpu.memory_space<vmem>>, vector<1x1x10x4xf32>
    %6 = vector.shape_cast %5 : vector<1x1x10x4xf32> to vector<10x4xf32>
    %c0_2 = arith.constant 0 : index
    %c0_3 = arith.constant 0 : index
    %c0_4 = arith.constant 0 : index
    %7 = vector.load %arg3[%c0_2, %c0_3, %c0_4] : memref<3x4x128xf32, #tpu.memory_space<vmem>>, vector<1x4x128xf32>
    %8 = vector.shape_cast %7 : vector<1x4x128xf32> to vector<4x128xf32>
    %cst_5 = arith.constant dense<0.000000e+00> : vector<10x128xf32>
    %9 = tpu.matmul %6, %8, %cst_5 {dimension_numbers = #tpu.dot_dimension_numbers<[1], [0], [0], [1], [0, 0, 1, 1], [], []>} : vector<10x4xf32>, vector<4x128xf32>, vector<10x128xf32> -> vector<10x128xf32>
    %10 = arith.addf %2, %9 : vector<10x128xf32>
    %c0_i32_6 = arith.constant 0 : i32
    %11 = arith.addi %1, %c0_i32_6 : i32
    %c0_7 = arith.constant 0 : index
    %c1 = arith.constant 1 : index
    %12 = arith.index_cast %11 : i32 to index
    %c0_8 = arith.constant 0 : index
    %13 = vector.load %arg2[%c0_7, %c1, %12, %c0_8] : memref<1x2x11x4xf32, #tpu.memory_space<vmem>>, vector<1x1x10x4xf32>
    %14 = vector.shape_cast %13 : vector<1x1x10x4xf32> to vector<10x4xf32>
    %c1_9 = arith.constant 1 : index
    %c0_10 = arith.constant 0 : index
    %c0_11 = arith.constant 0 : index
    %15 = vector.load %arg3[%c1_9, %c0_10, %c0_11] : memref<3x4x128xf32, #tpu.memory_space<vmem>>, vector<1x4x128xf32>
    %16 = vector.shape_cast %15 : vector<1x4x128xf32> to vector<4x128xf32>
    %cst_12 = arith.constant dense<0.000000e+00> : vector<10x128xf32>
    %17 = tpu.matmul %14, %16, %cst_12 {dimension_numbers = #tpu.dot_dimension_numbers<[1], [0], [0], [1], [0, 0, 1, 1], [], []>} : vector<10x4xf32>, vector<4x128xf32>, vector<10x128xf32> -> vector<10x128xf32>
    %18 = arith.addf %10, %17 : vector<10x128xf32>
    %c1_i32 = arith.constant 1 : i32
    %19 = arith.addi %1, %c1_i32 : i32
    %c0_13 = arith.constant 0 : index
    %c0_14 = arith.constant 0 : index
    %20 = arith.index_cast %19 : i32 to index
    %c0_15 = arith.constant 0 : index
    %21 = vector.load %arg2[%c0_13, %c0_14, %20, %c0_15] : memref<1x2x11x4xf32, #tpu.memory_space<vmem>>, vector<1x1x10x4xf32>
    %22 = vector.shape_cast %21 : vector<1x1x10x4xf32> to vector<10x4xf32>
    %c2 = arith.constant 2 : index
    %c0_16 = arith.constant 0 : index
    %c0_17 = arith.constant 0 : index
    %23 = vector.load %arg3[%c2, %c0_16, %c0_17] : memref<3x4x128xf32, #tpu.memory_space<vmem>>, vector<1x4x128xf32>
    %24 = vector.shape_cast %23 : vector<1x4x128xf32> to vector<4x128xf32>
    %cst_18 = arith.constant dense<0.000000e+00> : vector<10x128xf32>
    %25 = tpu.matmul %22, %24, %cst_18 {dimension_numbers = #tpu.dot_dimension_numbers<[1], [0], [0], [1], [0, 0, 1, 1], [], []>} : vector<10x4xf32>, vector<4x128xf32>, vector<10x128xf32> -> vector<10x128xf32>
    %26 = arith.addf %18, %25 : vector<10x128xf32>
    %27 = tpu.iota {dimensions = array<i32: 0>} : vector<10x1xi32>
    %c1_i32_19 = arith.constant 1 : i32
    %28 = arith.subi %1, %c1_i32_19 : i32
    %29 = vector.broadcast %28 : i32 to vector<10x1xi32>
    %30 = arith.addi %27, %29 : vector<10x1xi32>
    %c0_i32_20 = arith.constant 0 : i32
    %31 = vector.broadcast %c0_i32_20 : i32 to vector<10x1xi32>
    %32 = arith.cmpi sge, %30, %31 : vector<10x1xi32>
    %c8_i32_21 = arith.constant 8 : i32
    %33 = vector.broadcast %c8_i32_21 : i32 to vector<10x1xi32>
    %34 = arith.cmpi slt, %30, %33 : vector<10x1xi32>
    %35 = arith.andi %32, %34 : vector<10x1xi1>
    %c0_22 = arith.constant 0 : index
    %c0_23 = arith.constant 0 : index
    %36 = vector.load %arg6[%c0_22, %c0_23] : memref<1x128xf32, #tpu.memory_space<vmem>>, vector<1x128xf32>
    %37 = vector.broadcast %36 : vector<1x128xf32> to vector<10x128xf32>
    %38 = arith.addf %26, %37 : vector<10x128xf32>
    %cst_24 = arith.constant 0.000000e+00 : f32
    %39 = vector.broadcast %cst_24 : f32 to vector<10x128xf32>
    %40 = arith.maximumf %38, %39 : vector<10x128xf32>
    %cst_25 = arith.constant 0.000000e+00 : f32
    %41 = vector.shape_cast %35 : vector<10x1xi1> to vector<10x1xi1>
    %42 = vector.broadcast %41 : vector<10x1xi1> to vector<10x128xi1>
    %43 = vector.broadcast %cst_25 : f32 to vector<10x128xf32>
    %44 = arith.select %42, %40, %43 : vector<10x128xi1>, vector<10x128xf32>
    %c0_26 = arith.constant 0 : index
    %c0_27 = arith.constant 0 : index
    %45 = vector.load %arg10[%c0_26, %c0_27] : memref<10x128xf32, #tpu.memory_space<vmem>>, vector<10x128xf32>
    tpu.vector_store %arg10[%c0_26, %c0_27], %44 {strides = array<i32>} : memref<10x128xf32, #tpu.memory_space<vmem>>, vector<10x128xf32>,
    %c0_28 = arith.constant 0 : index
    %c0_29 = arith.constant 0 : index
    %46 = vector.load %arg10[%c0_28, %c0_29] : memref<10x128xf32, #tpu.memory_space<vmem>>, vector<8x128xf32>
    %c1_30 = arith.constant 1 : index
    %c0_31 = arith.constant 0 : index
    %47 = vector.load %arg10[%c1_30, %c0_31] : memref<10x128xf32, #tpu.memory_space<vmem>>, vector<8x128xf32>
    %c2_32 = arith.constant 2 : index
    %c0_33 = arith.constant 0 : index
    %48 = vector.load %arg10[%c2_32, %c0_33] : memref<10x128xf32, #tpu.memory_space<vmem>>, vector<8x128xf32>
    %49 = tpu.concatenate %46, %47, %48 in 1 : vector<8x128xf32>, vector<8x128xf32>, vector<8x128xf32> -> vector<8x384xf32>
    %c0_34 = arith.constant 0 : index
    %c0_35 = arith.constant 0 : index
    %50 = vector.load %arg4[%c0_34, %c0_35] : memref<384x128xf32, #tpu.memory_space<vmem>>, vector<384x128xf32>
    %cst_36 = arith.constant dense<0.000000e+00> : vector<8x128xf32>
    %51 = tpu.matmul %49, %50, %cst_36 {dimension_numbers = #tpu.dot_dimension_numbers<[1], [0], [0], [1], [0, 0, 1, 1], [], []>} : vector<8x384xf32>, vector<384x128xf32>, vector<8x128xf32> -> vector<8x128xf32>
    %c0_37 = arith.constant 0 : index
    %c0_38 = arith.constant 0 : index
    %52 = vector.load %arg7[%c0_37, %c0_38] : memref<1x128xf32, #tpu.memory_space<vmem>>, vector<1x128xf32>
    %53 = vector.broadcast %52 : vector<1x128xf32> to vector<8x128xf32>
    %54 = arith.addf %51, %53 : vector<8x128xf32>
    %c0_i32_39 = arith.constant 0 : i32
    %55 = arith.addi %1, %c0_i32_39 : i32
    %c1_i32_40 = arith.constant 1 : i32
    %56 = arith.addi %55, %c1_i32_40 : i32
    %c0_41 = arith.constant 0 : index
    %c1_42 = arith.constant 1 : index
    %57 = arith.index_cast %56 : i32 to index
    %c0_43 = arith.constant 0 : index
    %58 = vector.load %arg2[%c0_41, %c1_42, %57, %c0_43] : memref<1x2x11x4xf32, #tpu.memory_space<vmem>>, vector<1x1x8x4xf32>
    %59 = vector.shape_cast %58 : vector<1x1x8x4xf32> to vector<8x4xf32>
    %c0_44 = arith.constant 0 : index
    %c0_45 = arith.constant 0 : index
    %60 = vector.load %arg5[%c0_44, %c0_45] : memref<4x128xf32, #tpu.memory_space<vmem>>, vector<4x128xf32>
    %cst_46 = arith.constant dense<0.000000e+00> : vector<8x128xf32>
    %61 = tpu.matmul %59, %60, %cst_46 {dimension_numbers = #tpu.dot_dimension_numbers<[1], [0], [0], [1], [0, 0, 1, 1], [], []>} : vector<8x4xf32>, vector<4x128xf32>, vector<8x128xf32> -> vector<8x128xf32>
    %62 = arith.addf %54, %61 : vector<8x128xf32>
    %c0_47 = arith.constant 0 : index
    %c0_48 = arith.constant 0 : index
    %63 = vector.load %arg8[%c0_47, %c0_48] : memref<1x128xf32, #tpu.memory_space<vmem>>, vector<1x128xf32>
    %64 = vector.broadcast %63 : vector<1x128xf32> to vector<8x128xf32>
    %65 = arith.addf %62, %64 : vector<8x128xf32>
    %cst_49 = arith.constant 0.000000e+00 : f32
    %66 = vector.broadcast %cst_49 : f32 to vector<8x128xf32>
    %67 = arith.maximumf %65, %66 : vector<8x128xf32>
    %c0_50 = arith.constant 0 : index
    %c0_51 = arith.constant 0 : index
    %c0_52 = arith.constant 0 : index
    %68 = vector.load %arg9[%c0_50, %c0_51, %c0_52] : memref<1x8x128xf32, #tpu.memory_space<vmem>>, vector<1x8x128xf32>
    %69 = vector.shape_cast %68 : vector<1x8x128xf32> to vector<8x128xf32>
    %70 = vector.shape_cast %67 : vector<8x128xf32> to vector<1x8x128xf32>
    tpu.vector_store %arg9[%c0_50, %c0_51, %c0_52], %70 {strides = array<i32>} : memref<1x8x128xf32, #tpu.memory_space<vmem>>, vector<1x8x128xf32>,
    return
  }
  func.func @transform_0(%arg0: i32, %arg1: i32) -> (i32, i32, i32, i32) {
    %c0_i32 = arith.constant 0 : i32
    %c0_i32_0 = arith.constant 0 : i32
    %c0_i32_1 = arith.constant 0 : i32
    %c0_i32_2 = arith.constant 0 : i32
    return %arg0, %c0_i32, %c0_i32_0, %c0_i32_1 : i32, i32, i32, i32
  }
  func.func @transform_1(%arg0: i32, %arg1: i32) -> (i32, i32, i32) {
    %c0_i32 = arith.constant 0 : i32
    %c0_i32_0 = arith.constant 0 : i32
    %c0_i32_1 = arith.constant 0 : i32
    %c0_i32_2 = arith.constant 0 : i32
    return %c0_i32, %c0_i32_0, %c0_i32_1 : i32, i32, i32
  }
  func.func @transform_2(%arg0: i32, %arg1: i32) -> (i32, i32) {
    %c0_i32 = arith.constant 0 : i32
    %c0_i32_0 = arith.constant 0 : i32
    %c0_i32_1 = arith.constant 0 : i32
    return %c0_i32, %c0_i32_0 : i32, i32
  }
  func.func @transform_3(%arg0: i32, %arg1: i32) -> (i32, i32) {
    %c0_i32 = arith.constant 0 : i32
    %c0_i32_0 = arith.constant 0 : i32
    %c0_i32_1 = arith.constant 0 : i32
    return %c0_i32, %c0_i32_0 : i32, i32
  }
  func.func @transform_4(%arg0: i32, %arg1: i32) -> (i32, i32) {
    %c0_i32 = arith.constant 0 : i32
    %c0_i32_0 = arith.constant 0 : i32
    %c0_i32_1 = arith.constant 0 : i32
    return %c0_i32, %c0_i32_0 : i32, i32
  }
  func.func @transform_5(%arg0: i32, %arg1: i32) -> (i32, i32) {
    %c0_i32 = arith.constant 0 : i32
    %c0_i32_0 = arith.constant 0 : i32
    %c0_i32_1 = arith.constant 0 : i32
    return %c0_i32, %c0_i32_0 : i32, i32
  }
  func.func @transform_6(%arg0: i32, %arg1: i32) -> (i32, i32) {
    %c0_i32 = arith.constant 0 : i32
    %c0_i32_0 = arith.constant 0 : i32
    %c0_i32_1 = arith.constant 0 : i32
    return %c0_i32, %c0_i32_0 : i32, i32
  }
  func.func @transform_7(%arg0: i32, %arg1: i32) -> (i32, i32, i32) {
    %c0_i32 = arith.constant 0 : i32
    %c0_i32_0 = arith.constant 0 : i32
    return %arg0, %arg1, %c0_i32 : i32, i32, i32
  }
}

</mosaic_0001>

<bundles_post_ra>
// kernel: residual_block_1d.1
= control target key start
LH: loop header
LB: loop body
LE: loop exit
PB: predicated region body
PF: predicated region fallthrough
CT: control target
= control target key end

     0   :  { %s1278_s24 = smov 0   ;;  %s1280_s25 = smov 0   ;;  %s1513_s0 = inlined_call_operand.vmem [shape: f32[2,2,11,4], index: 0, kind: input, shape index: {}]   ;;  %s1514_s1 = inlined_call_operand.vmem [shape: f32[3,4,128], index: 1, kind: input, shape index: {}]   ;;  %s1515_s2 = inlined_call_operand.vmem [shape: f32[384,128], index: 2, kind: input, shape index: {}]   ;;  %s1516_s3 = inlined_call_operand.vmem [shape: f32[4,128], index: 3, kind: input, shape index: {}]   ;;  %s1517_s4 = inlined_call_operand.vmem [shape: f32[1,128], index: 4, kind: input, shape index: {}]   ;;  %s1518_s5 = inlined_call_operand.vmem [shape: f32[1,128], index: 5, kind: input, shape index: {}]   ;;  %s1519_s6 = inlined_call_operand.vmem [shape: f32[1,128], index: 6, kind: input, shape index: {}]   ;;  %s1520_s7 = inlined_call_operand.vmem [shape: f32[2,8,128], index: 7, kind: output, shape index: {}]  }
   0x1   :  { %s1282_s26 = smov 0  }
   0x2 LB: > { %s29_s27 = sadd.s32 1, %s1229_s25  ;;  %p977_p0 = scmp.ge.s32.totalorder %s1233_s26, 1  ;;  %s1233_s26 = sphi %s1282_s26, %s17_s26   ;;  %s1229_s25 = sphi %s1280_s25, %s1522_s25   ;;  %s1225_s24 = sphi %s1278_s24, %s1521_s24  }
   0x3   : > { %p31_p1 = scmp.ge.s32.totalorder %s29_s27, 2  ;;  %p251_p2 = scmp.lt.s32.totalorder %s1233_s26, 3 }
   0x5   : > { %s1524_s27 = smov (%p31_p1, %s29_s27), 0  ;;  %p252_p3 = pnand %p977_p0, %p251_p2 }
   0x6   : > { %v301_v0 = vld [vmem:[%s1514_s1] sm:$0xf] (!%p252_p3)  ;;  %vm315_vm0 = vcmask (!%p252_p3), 1043456   ;;  %p285_p4 = scmp.lt.s32.totalorder (!%p252_p3), %s1225_s24, 1  ;;  %v992_v1 = vld [vmem:[%s1514_s1 + $0x8] sm:$0xf] (!%p252_p3) }
   0x7   : > { %255 = sbr.rel (%p252_p3) target bundleno = 482 (0x1e2), region = 48  ;;  %1073 = vmatprep.subr.msk.mxu0 (!%p252_p3), %vm315_vm0, %v301_v0  ;;  %v983_v2 = vld [vmem:[%s1514_s1 + $0x4] sm:$0xf] (!%p252_p3)  ;;  %v622_v4 = vld [vmem:[%s1515_s2 + $0x88] sm:$0xff] (!%p252_p3)  ;;  %vm308_vm1 = vcmask (!%p252_p3), 31744   ;;  %v623_v8 = vld [vmem:[%s1515_s2 + $0x90] sm:$0xff] (!%p252_p3) }
   0x8   : > { %v621_v3 = vld [vmem:[%s1515_s2 + $0x80] sm:$0xff] (!%p252_p3)  ;;  %1074 = vmatpush3.msk.msra.mxu0 (!%p252_p3), %vm315_vm0, %v301_v0  ;;  %1068 = vmatprep.subr.msk.mxu1 (!%p252_p3), %vm315_vm0, %v983_v2  ;;  %v606_v7 = vld [vmem:[%s1515_s2 + $0x8] sm:$0xff] (!%p252_p3)  ;;  %v624_v9 = vld [vmem:[%s1515_s2 + $0x98] sm:$0xff] (!%p252_p3)  ;;  %v1235_v21 = vmov (!%p252_p3), 0.0|0.0   ;;  %vm1236_vm2 = vmmov (!%p252_p3), 0  }
   0x9   : > { %1078 = vmatprep.subr.msk.mxu0 (!%p252_p3), %vm315_vm0, %v992_v1  ;;  %1069 = vmatpush3.msk.msra.mxu1 (!%p252_p3), %vm315_vm0, %v983_v2  ;;  %v1123_v5 = vpack.c.bf16 (!%p252_p3), %v622_v4, %v621_v3  ;;  %v605_v6 = vld [vmem:[%s1515_s2] sm:$0xff] (!%p252_p3)  ;;  %v607_v10 = vld [vmem:[%s1515_s2 + $0x10] sm:$0xff] (!%p252_p3)  ;;  %v1127_v17 = vpack.c.bf16 (!%p252_p3), %v624_v9, %v623_v8  ;;  %v608_v18 = vld [vmem:[%s1515_s2 + $0x18] sm:$0xff] (!%p252_p3) }
   0xa   : > { %v1125_v14 = vpack.c.bf16 (!%p252_p3), %v606_v7, %v605_v6  ;;  %v625_v19 = vld [vmem:[%s1515_s2 + $0xa0] sm:$0xff] (!%p252_p3)  ;;  %v626_v20 = vld [vmem:[%s1515_s2 + $0xa8] sm:$0xff] (!%p252_p3)  ;;  %v1129_v24 = vpack.c.bf16 (!%p252_p3), %v608_v18, %v607_v10  ;;  %v627_v28 = vld [vmem:[%s1515_s2 + $0xb0] sm:$0xff] (!%p252_p3) }
   0xb   : > { %1124 = vmatprep.subr.bf16.mxu1 (!%p252_p3), %v1123_v5  ;;  %v637_v22 = vld [vmem:[%s1515_s2 + $0x100] sm:$0xff] (!%p252_p3)  ;;  %v638_v23 = vld [vmem:[%s1515_s2 + $0x108] sm:$0xff] (!%p252_p3)  ;;  %v1131_v25 = vpack.c.bf16 (!%p252_p3), %v626_v20, %v625_v19  ;;  %v628_v29 = vld [vmem:[%s1515_s2 + $0xb8] sm:$0xff] (!%p252_p3)  ;;  %v570_v19 = vlaneseq (!%p252_p3) }
   0xc   : > { %v609_v26 = vld [vmem:[%s1515_s2 + $0x20] sm:$0xff] (!%p252_p3)  ;;  %v610_v27 = vld [vmem:[%s1515_s2 + $0x28] sm:$0xff] (!%p252_p3)  ;;  %v1156_v31 = vpack.c.bf16 (!%p252_p3), %v638_v23, %v637_v22  ;;  %v639_v32 = vld [vmem:[%s1515_s2 + $0x110] sm:$0xff] (!%p252_p3)  ;;  %v1135_v35 = vpack.c.bf16 (!%p252_p3), %v628_v29, %v627_v28 }
   0xd   : > { %v640_v33 = vld [vmem:[%s1515_s2 + $0x118] sm:$0xff] (!%p252_p3)  ;;  %v1133_v34 = vpack.c.bf16 (!%p252_p3), %v610_v27, %v609_v26  ;;  %v641_v37 = vld [vmem:[%s1515_s2 + $0x120] sm:$0xff] (!%p252_p3)  ;;  %v642_v38 = vld [vmem:[%s1515_s2 + $0x128] sm:$0xff] (!%p252_p3)  ;;  %v571_v22 = vshrl.u32 (!%p252_p3), %v570_v19, 7 }
   0xe   : > { %s1526_s24 = smov (!%p285_p4, %s1225_s24), 1  ;;  %v1159_v36 = vpack.c.bf16 %v640_v33, %v639_v32  ;;  %v1162_v39 = vpack.c.bf16 %v642_v38, %v641_v37  ;;  %v643_v40 = vld [vmem:[%s1515_s2 + $0x130] sm:$0xff]  ;;  %v644_v41 = vld [vmem:[%s1515_s2 + $0x138] sm:$0xff]  ;;  %v629_v46 = vld [vmem:[%s1515_s2 + $0xc0] sm:$0xff] }
   0xf   : > { %s1004_s19 = sshll.u32 %s1526_s24, 5  ;;  %v1165_v42 = vpack.c.bf16 %v644_v41, %v643_v40  ;;  %v611_v43 = vld [vmem:[%s1515_s2 + $0x30] sm:$0xff]  ;;  %v612_v44 = vld [vmem:[%s1515_s2 + $0x38] sm:$0xff]  ;;  %v630_v47 = vld [vmem:[%s1515_s2 + $0xc8] sm:$0xff] }
  0x10   : > { %s1334_s30 = scalar_lea.vmem %s1513_s0, %s1004_s19  ;;  %v1137_v45 = vpack.c.bf16 %v612_v44, %v611_v43  ;;  %v645_v48 = vld [vmem:[%s1515_s2 + $0x140] sm:$0xff]  ;;  %v1139_v49 = vpack.c.bf16 %v630_v47, %v629_v46  ;;  %v646_v50 = vld [vmem:[%s1515_s2 + $0x148] sm:$0xff]  ;;  %v631_v55 = vld [vmem:[%s1515_s2 + $0xd0] sm:$0xff] }
  0x11   : > { %v299_v11 = vld [vmem:[%s1334_s30] sm:$0xff]  ;;  %v300_v12 = vld [vmem:[%s1334_s30 + $0x8] sm:$0x3]  ;;  %v981_v13 = vld [vmem:[%s1334_s30 + $0x10] sm:$0xff]  ;;  %v1168_v53 = vpack.c.bf16 %v646_v50, %v645_v48 }
  0x12   : > { %1075 = vmatprep.mubr.msk.f32.mxu0 %vm308_vm1, %v299_v11  ;;  %1070 = vmatprep.mubr.msk.f32.mxu1 %vm308_vm1, %v981_v13  ;;  %v982_v15 = vld [vmem:[%s1334_s30 + $0x18] sm:$0x3]  ;;  %v990_v16 = vld [vmem:[%s1334_s30 + $0x1] sm:$0xff]  ;;  %v991_v30 = vld [vmem:[%s1334_s30 + $0x9] sm:$0x3] }
  0x13   : > { %1076 = vmatmul.mubr.msk.f32.vlgmr.msra.gmra.mrb[0].mxu0 %vm308_vm1, %v300_v12  ;;  %1071 = vmatmul.mubr.msk.f32.vlgmr.msra.gmra.mrb[0].mxu1 %vm308_vm1, %v982_v15  ;;  %v613_v51 = vld [vmem:[%s1515_s2 + $0x40] sm:$0xff]  ;;  %v614_v52 = vld [vmem:[%s1515_s2 + $0x48] sm:$0xff]  ;;  %v632_v56 = vld [vmem:[%s1515_s2 + $0xd8] sm:$0xff] }
  0x14   : > { %1079 = vmatpush3.msk.msra.mxu0 %vm315_vm0, %v992_v1  ;;  %1080 = vmatprep.mubr.msk.f32.mxu0 %vm308_vm1, %v990_v16  ;;  %v1141_v54 = vpack.c.bf16 %v614_v52, %v613_v51  ;;  %v647_v57 = vld [vmem:[%s1515_s2 + $0x150] sm:$0xff]  ;;  %v1143_v58 = vpack.c.bf16 %v632_v56, %v631_v55  ;;  %v648_v59 = vld [vmem:[%s1515_s2 + $0x158] sm:$0xff]  ;;  %v633_v0 = vld [vmem:[%s1515_s2 + $0xe0] sm:$0xff]  ;;  %v1237_v16 = vmov 0.0  }
  0x15   : > { %1155 = vmatprep.subr.bf16.mxu0 %v1235_v21  ;;  %1126 = vmatpush3.bf16.msra.mxu1 %v1125_v14  ;;  %v615_v60 = vld [vmem:[%s1515_s2 + $0x50] sm:$0xff]  ;;  %v616_v61 = vld [vmem:[%s1515_s2 + $0x58] sm:$0xff]  ;;  %v1171_v62 = vpack.c.bf16 %v648_v59, %v647_v57  ;;  %v634_v1 = vld [vmem:[%s1515_s2 + $0xe8] sm:$0xff] }
  0x16   : > { %1128 = vmatprep.subr.bf16.mxu1 %v1127_v17  ;;  %v1145_v63 = vpack.c.bf16 %v616_v61, %v615_v60  ;;  %v649_v2 = vld [vmem:[%s1515_s2 + $0x160] sm:$0xff]  ;;  %v1147_v3 = vpack.c.bf16 %v634_v1, %v633_v0  ;;  %v650_v4 = vld [vmem:[%s1515_s2 + $0x168] sm:$0xff]  ;;  %v635_v9 = vld [vmem:[%s1515_s2 + $0xf0] sm:$0xff] }
  0x17   : > { %v617_v5 = vld [vmem:[%s1515_s2 + $0x60] sm:$0xff]  ;;  %v618_v6 = vld [vmem:[%s1515_s2 + $0x68] sm:$0xff]  ;;  %v1174_v7 = vpack.c.bf16 %v650_v4, %v649_v2  ;;  %v636_v10 = vld [vmem:[%s1515_s2 + $0xf8] sm:$0xff] }
  0x18   : > { %v1149_v8 = vpack.c.bf16 %v618_v6, %v617_v5  ;;  %v651_v11 = vld [vmem:[%s1515_s2 + $0x170] sm:$0xff]  ;;  %v1151_v12 = vpack.c.bf16 %v636_v10, %v635_v9  ;;  %v652_v13 = vld [vmem:[%s1515_s2 + $0x178] sm:$0xff]  ;;  %v996_v27 = vld [vmem:[%s1517_s4] ss:$0 sm:$0xff] }
  0x19   : > { %1130 = vmatpush3.bf16.msra.mxu1 %v1129_v24  ;;  %v619_v14 = vld [vmem:[%s1515_s2 + $0x70] sm:$0xff]  ;;  %v620_v15 = vld [vmem:[%s1515_s2 + $0x78] sm:$0xff]  ;;  %v1177_v17 = vpack.c.bf16 %v652_v13, %v651_v11  ;;  %v572_v24 = vadd.s32 8, %v571_v22  ;;  %v997_v44 = vld [vmem:[%s1518_s5] ss:$0 sm:$0xff] }
  0x1a   : > { %1132 = vmatprep.subr.bf16.mxu1 %v1131_v25  ;;  %v1153_v18 = vpack.c.bf16 %v620_v15, %v619_v14  ;;  %v998_v40 = vld [vmem:[%s1334_s30 + $0x11] sm:$0xff]  ;;  %v1001_v51 = vld [vmem:[%s1519_s6] ss:$0 sm:$0xff]  ;;  %s980_s30 = sshll.u32 %s1526_s24, 3 }
  0x1b   : > { %1081 = vmatmul.mubr.msk.f32.vlgmr.msra.gmra.mrb[0].mxu0 %vm308_vm1, %v991_v30  ;;  %v576_v26 = vadd.s32 4294967295, %v572_v24  ;;  %v575_v30 = vadd.s32 4294967295, %v571_v22  ;;  %s296_s12 = scalar_lea.vmem %s1520_s7, %s980_s30 }
  0x1c   : > { %1157 = vmatpush3.bf16.msra.mxu0 %v1156_v31  ;;  %1115 = vmatprep.mubr.msk.f32.mxu0 %vm1236_vm2, %v1237_v16 }
  0x1d   : > { %1158 = vmatprep.subr.bf16.mxu0 %v1235_v21  ;;  %1134 = vmatpush3.bf16.msra.mxu1 %v1133_v34  ;;  %vm580_vm3 = vcmp.lt.s32.totalorder %v576_v26, 8  ;;  %vm577_vm4 = vcmp.ge.s32.totalorder %v575_v30, 0 }
  0x1e   : > { %1136 = vmatprep.subr.bf16.mxu1 %v1135_v35 }
  0x20   : > { %1160 = vmatpush3.bf16.msra.mxu0 %v1159_v36 }
  0x21   : > { %1161 = vmatprep.subr.bf16.mxu0 %v1235_v21  ;;  %1138 = vmatpush3.bf16.msra.mxu1 %v1137_v45 }
  0x22   : > { %1140 = vmatprep.subr.bf16.mxu1 %v1139_v49 }
  0x24   : > { %1163 = vmatpush3.bf16.msra.mxu0 %v1162_v39  ;;  %v803_v39 = vld [vmem:[%s1516_s3] sm:$0xf] }
  0x25   : > { %1164 = vmatprep.subr.bf16.mxu0 %v1235_v21  ;;  %1142 = vmatpush3.bf16.msra.mxu1 %v1141_v54 }
  0x26   : > { %1144 = vmatprep.subr.bf16.mxu1 %v1143_v58 }
  0x28   : > { %1166 = vmatpush3.bf16.msra.mxu0 %v1165_v42 }
  0x29   : > { %1167 = vmatprep.subr.bf16.mxu0 %v1235_v21  ;;  %1146 = vmatpush3.bf16.msra.mxu1 %v1145_v63 }
  0x2a   : > { %1148 = vmatprep.subr.bf16.mxu1 %v1147_v3 }
  0x2c   : > { %1169 = vmatpush3.bf16.msra.mxu0 %v1168_v53 }
  0x2d   : > { %1170 = vmatprep.subr.bf16.mxu0 %v1235_v21  ;;  %1150 = vmatpush3.bf16.msra.mxu1 %v1149_v8 }
  0x2e   : > { %1152 = vmatprep.subr.bf16.mxu1 %v1151_v12 }
  0x30   : > { %1172 = vmatpush3.bf16.msra.mxu0 %v1171_v62 }
  0x31   : > { %1173 = vmatprep.subr.bf16.mxu0 %v1235_v21  ;;  %1154 = vmatpush3.bf16.msra.mxu1 %v1153_v18 }
  0x32   : > { %1118 = vmatprep.subr.mxu1 %v1237_v16 }
  0x34   : > { %1175 = vmatpush3.bf16.msra.mxu0 %v1174_v7 }
  0x35   : > { %1176 = vmatprep.subr.bf16.mxu0 %v1235_v21 }
  0x38   : > { %1178 = vmatpush3.bf16.msra.mxu0 %v1177_v17 }
  0xe6   : > { %v1072_v20 = vpop.f32.mrb[0].mxu1 }
  0xe7   : > { %v385_v23 = vpop.f32.mrb[1].mxu1 }
  0xee   : > { %v1082_v25 = vpop.f32.mrb[0].mxu0 }
  0xef   : > { %v1179_v28 = vadd.f32 %v1082_v25, %v1072_v20  ;;  %v559_v29 = vpop.f32.mrb[1].mxu0 }
  0xf0   : > { %v1180_v31 = vadd.f32 %v559_v29, %v385_v23 }
  0xf1   : > { %v591_v21 = vadd.f32 %v1179_v28, %v996_v27 }
  0xf2   : > { %v590_v32 = vadd.f32 %v1180_v31, %v996_v27 }
  0xf3   : > { %v593_v33 = vmax.f32 %v591_v21, 0.0 }
  0xf4   : > { %v592_v34 = vmax.f32 %v590_v32, 0.0 }
  0xf5   : > { %v599_v35 = vsel %vm580_vm3, %v593_v33, 0.0 }
  0xf6   : > { %601 = vst [vmem:[#allocation2 + $0x8] sm:$0x3] %v599_v35  ;;  %v598_v36 = vsel %vm577_vm4, %v592_v34, 0.0 }
  0xf7   : > { %600 = vst [vmem:[#allocation2] sm:$0xff] %v598_v36 }
  0xfe   : > { %v603_v37 = vld [vmem:[#allocation2 + $0x1] sm:$0xff] }
  0xff   : > { %v604_v38 = vld [vmem:[#allocation2 + $0x2] sm:$0xff]  ;;  %724 = vmatprep.mubr.f32.mxu1 %v603_v37 }
 0x100   : > { %1116 = vmatmul.mubr.f32.vlgmr.msra.gmra.mrb[2].mxu0 %v604_v38  ;;  %1210 = vmatmul.mubr.msk.f32.vlgmr.msra.gmra.mrb[2].mxu1 %vm577_vm4, %v592_v34 }
 0x101   : > { %1119 = vmatpush3.msk.msra.mxu1 %vm315_vm0, %v803_v39  ;;  %1120 = vmatprep.mubr.msk.f32.mxu1 %vm1236_vm2, %v1237_v16 }
 0x104   : > { %1121 = vmatmul.mubr.msk.f32.vlgmr.msra.gmra.mrb[4].mxu1 %vm308_vm1, %v998_v40 }
 0x1d3   : > { %v796_v41 = vpop.f32.mrb[2].mxu0  ;;  %v1046_v42 = vpop.f32.mrb[2].mxu1 }
 0x1d4   : > { %v1117_v43 = vpop.f32.mrb[3].mxu0  ;;  %v1047_v45 = vpop.f32.mrb[3].mxu1 }
 0x1d5   : > { %v1048_v46 = vadd.f32 %v1047_v45, %v1046_v42 }
 0x1d7   : > { %v727_v47 = vadd.f32 %v1048_v46, %v997_v44  ;;  %v876_v48 = vpop.f32.mrb[4].mxu1 }
 0x1d8   : > { %v1122_v49 = vpop.f32.mrb[5].mxu1 }
 0x1d9   : > { %v797_v50 = vadd.f32 %v796_v41, %v727_v47 }
 0x1db   : > { %v880_v52 = vadd.f32 %v876_v48, %v797_v50 }
 0x1dd   : > { %v888_v53 = vadd.f32 %v1001_v51, %v880_v52 }
 0x1df   : > { %v889_v54 = vmax.f32 %v888_v53, 0.0 }
 0x1e1   : > { %890 = vst [vmem:[%s296_s12] sm:$0xff] %v889_v54 }
 0x1e2 PF: > { %s17_s26 = sadd.s32 1, %s1233_s26   ;;  %s1521_s24 = smov %s1229_s25 }
 0x1e3   : > { %p14_p5 = scmp.ge.s32.totalorder %s17_s26, 4   ;;  %s1522_s25 = smov %s1524_s27 }
 0x1e5   :  { %16 = sbr.rel (!%p14_p5) target bundleno = 2 (0x2), region = 84 }

</bundles_post_ra>
